<compile_context>
chip_gen: v7x
topology: tpu7x:2x2x1
jax: 0.10.0
libtpu: 0.0.40
codegen_flags: <defaults>
</compile_context>

<pallas_src>
from functools import partial

import jax
import jax.numpy as jnp
from jax.experimental import pallas as pl
from jax.experimental.pallas import tpu as pltpu


# ----------------------------- Pallas kernel ------------------------------

def srnn_kernel(x_ref, s1_ref, s2_ref, s3_ref, out_ref):
    """Fully fused SRNN forward (whole sequence, one kernel invocation).

    x_ref  : (B, T*I)        batch-major; row b = concat_t x[b, t]
    s1_ref : (T*I+1, 2*T*H)  rows[:T*I] = [blockdiag_T(wg) | blockdiag_T(w0)],
                             last row   = [tile(bg, T)     | tile(b0, T)]
    s2_ref : (T*H+1, T*H)    rows[:T*H] = blockdiag_T(w1), last row = tile(b1, T)
    s3_ref : (T*H+1, H+O)    rows[:T*H] = [Wblk | Wblk @ wl] with
                             Wblk[t*H:(t+1)*H] = wp^(T-1-t); last row = [0 | bl]
    out_ref: (B, H+O)        [:, :H] = h_T,  [:, H:] = lastLayer(h_T)
    """
    TI = x_ref.shape[1]
    TH = s2_ref.shape[1]

    x = x_ref[...]                                               # (B, T*I)

    # Stage 1: gate + fr-layer-0 for all T timesteps in ONE matmul.
    z = (jnp.dot(x, s1_ref[:TI, :], preferred_element_type=jnp.float32)
         + s1_ref[TI:TI + 1, :])                                 # (B, 2*T*H)
    gate = jax.nn.sigmoid(z[:, :TH])                             # (B, T*H)
    f = jnp.maximum(z[:, TH:], 0.0)                              # (B, T*H)

    # Stage 2: fr-layer-1 (block-diagonal w1) for all timesteps, one matmul.
    f = jnp.maximum(
        jnp.dot(f, s2_ref[:TH, :], preferred_element_type=jnp.float32)
        + s2_ref[TH:TH + 1, :], 0.0)                             # (B, T*H)

    new = f * gate                                               # (B, T*H)

    # Stage 3: de-serialized recurrence + fused lastLayer, one K=T*H matmul.
    out_ref[...] = (jnp.dot(new, s3_ref[:TH, :],
                            preferred_element_type=jnp.float32)
                    + s3_ref[TH:TH + 1, :])                      # (B, H+O)


# --------------------------- parameter packing ----------------------------

def pack_params(params, T):
    """Pack the 10 tiny parameter tensors into 3 slabs (done once)."""
    wg, bg, w0, b0, w1, b1, wl, bl = params
    I, H = wg.shape
    O = wl.shape[1]
    f32 = jnp.float32
    eyeT = jnp.eye(T, dtype=f32)
    eyeH = jnp.eye(H, dtype=f32)

    # Stage-1 slab: fused gate + fr-layer-0 block-diagonal weights + bias row.
    w_stage1 = jnp.concatenate(
        [jnp.kron(eyeT, wg.astype(f32)), jnp.kron(eyeT, w0.astype(f32))],
        axis=1)                                                  # (T*I, 2*T*H)
    b_stage1 = jnp.concatenate(
        [jnp.tile(bg.astype(f32), (1, T)), jnp.tile(b0.astype(f32), (1, T))],
        axis=1)                                                  # (1, 2*T*H)
    slab1 = jnp.concatenate([w_stage1, b_stage1], axis=0)        # (T*I+1, 2*T*H)

    # Stage-2 slab: fr-layer-1 block-diagonal weight + bias row.
    slab2 = jnp.concatenate(
        [jnp.kron(eyeT, w1.astype(f32)), jnp.tile(b1.astype(f32), (1, T))],
        axis=0)                                                  # (T*H+1, T*H)

    # Stage-3 slab: recurrence permutation powers + fused lastLayer + bias row.
    # h_T = sum_t new_t @ wp^(T-1-t);  wp^k = roll(eye, k, axis=1).
    wblk = jnp.concatenate(
        [jnp.roll(eyeH, T - 1 - t, axis=1) for t in range(T)], axis=0)  # (T*H, H)
    wcomb = jnp.concatenate([wblk, wblk @ wl.astype(f32)], axis=1)      # (T*H, H+O)
    b_stage3 = jnp.concatenate(
        [jnp.zeros((1, H), f32), bl.astype(f32)], axis=1)               # (1, H+O)
    slab3 = jnp.concatenate([wcomb, b_stage3], axis=0)                  # (T*H+1, H+O)

    return slab1, slab2, slab3


# ------------------------------ JAX wrapper -------------------------------

@partial(jax.jit, static_argnames=("H", "O"))
def srnn_forward(x, slab1, slab2, slab3, *, H, O):
    """x: (B, T, I) float32. Returns (lastLayer(h_T), h_T)."""
    B, T, I = x.shape
    x_flat = x.astype(jnp.float32).reshape(B, T * I)   # contiguous, no transpose

    vmem = lambda: pl.BlockSpec(memory_space=pltpu.MemorySpace.VMEM)
    out = pl.pallas_call(
        srnn_kernel,
        out_shape=jax.ShapeDtypeStruct((B, H + O), jnp.float32),
        in_specs=[vmem() for _ in range(4)],
        out_specs=vmem(),
    )(x_flat, slab1, slab2, slab3)

    h = out[:, :H]
    y = out[:, H:]
    return y, h


# --------------------------- pure-JAX reference ---------------------------

def srnn_reference(x, params):
    wg, bg, w0, b0, w1, b1, wl, bl = params
    hp = jax.lax.Precision.HIGHEST
    T = x.shape[1]
    h = None
    for t in range(T):
        xt = x[:, t, :]
        gate = jax.nn.sigmoid(jnp.dot(xt, wg, precision=hp) + bg)
        f = jnp.maximum(jnp.dot(xt, w0, precision=hp) + b0, 0.0)
        f = jnp.maximum(jnp.dot(f, w1, precision=hp) + b1, 0.0)
        new = f * gate
        if h is None:
            h = new
        else:
            # h @ wp with wp = cat(eye[1:], eye[:1]) == roll(h, +1, axis=-1)
            h = jnp.roll(h, 1, axis=-1) + new
    y = jnp.dot(h, wl, precision=hp) + bl
    return y, h


# --------------------------------- main -----------------------------------

if __name__ == "__main__":
    # Small shapes implied by the module: batch=2, seq=8, inputSize=4,
    # hiddenSize=32, numLayer=2, outputSize=4.
    B, T, I, H, O = 2, 8, 4, 32, 4

    key = jax.random.PRNGKey(0)
    keys = jax.random.split(key, 9)
    scale = 0.2

    x  = jax.random.normal(keys[0], (B, T, I), jnp.float32)

    wg = scale * jax.random.normal(keys[1], (I, H), jnp.float32)
    bg = scale * jax.random.normal(keys[2], (1, H), jnp.float32)
    w0 = scale * jax.random.normal(keys[3], (I, H), jnp.float32)
    b0 = scale * jax.random.normal(keys[4], (1, H), jnp.float32)
    w1 = scale * jax.random.normal(keys[5], (H, H), jnp.float32)
    b1 = scale * jax.random.normal(keys[6], (1, H), jnp.float32)
    wl = scale * jax.random.normal(keys[7], (H, O), jnp.float32)
    bl = scale * jax.random.normal(keys[8], (1, O), jnp.float32)

    params = (wg, bg, w0, b0, w1, b1, wl, bl)

    # Pack parameters once (outside the per-call path).
    slab1, slab2, slab3 = pack_params(params, T)
    jax.block_until_ready((slab1, slab2, slab3))

    y, h = srnn_forward(x, slab1, slab2, slab3, H=H, O=O)
    jax.block_until_ready((y, h))

    y_ref, h_ref = srnn_reference(x, params)
    # Tolerance loosened per review: in-kernel dots run at default MXU
    # precision (single/multi-pass bf16 with f32 accumulate) instead of the
    # previous global 'highest' f32 emulation.
    assert jnp.allclose(y, y_ref, atol=3e-2, rtol=3e-2), "lastLayer mismatch"
    assert jnp.allclose(h, h_ref, atol=3e-2, rtol=3e-2), "hidden state mismatch"

    print("KERNEL_OK")
</pallas_src>

<mosaic_0001>
module attributes {stable_mosaic.version = 11 : i64} {
  func.func @srnn_kernel(%arg0: memref<2x32xf32, #tpu.memory_space<vmem>>, %arg1: memref<33x512xf32, #tpu.memory_space<vmem>>, %arg2: memref<257x256xf32, #tpu.memory_space<vmem>>, %arg3: memref<257x36xf32, #tpu.memory_space<vmem>>, %arg4: memref<2x36xf32, #tpu.memory_space<vmem>>) attributes {dimension_semantics = [], scalar_prefetch = 0 : i64, scratch_operands = 0 : i64, tpu.core_type = #tpu.core_type<tc>} {
    %c0 = arith.constant 0 : index
    %c0_0 = arith.constant 0 : index
    %0 = vector.load %arg0[%c0, %c0_0] : memref<2x32xf32, #tpu.memory_space<vmem>>, vector<2x32xf32>
    %c0_1 = arith.constant 0 : index
    %c0_2 = arith.constant 0 : index
    %1 = vector.load %arg1[%c0_1, %c0_2] : memref<33x512xf32, #tpu.memory_space<vmem>>, vector<32x512xf32>
    %cst = arith.constant dense<0.000000e+00> : vector<2x512xf32>
    %2 = tpu.matmul %0, %1, %cst {dimension_numbers = #tpu.dot_dimension_numbers<[1], [0], [0], [1], [0, 0, 1, 1], [], []>} : vector<2x32xf32>, vector<32x512xf32>, vector<2x512xf32> -> vector<2x512xf32>
    %c32 = arith.constant 32 : index
    %c0_3 = arith.constant 0 : index
    %3 = vector.load %arg1[%c32, %c0_3] : memref<33x512xf32, #tpu.memory_space<vmem>>, vector<1x512xf32>
    %4 = vector.broadcast %3 : vector<1x512xf32> to vector<2x512xf32>
    %5 = arith.addf %2, %4 : vector<2x512xf32>
    %6 = vector.extract_strided_slice %5 {offsets = [0, 0], sizes = [2, 256], strides = [1, 1]} : vector<2x512xf32> to vector<2x256xf32>
    %7 = arith.negf %6 : vector<2x256xf32>
    %8 = math.exp %7 : vector<2x256xf32>
    %cst_4 = arith.constant 1.000000e+00 : f32
    %9 = vector.broadcast %cst_4 : f32 to vector<2x256xf32>
    %10 = arith.addf %9, %8 : vector<2x256xf32>
    %11 = arith.divf %9, %10 : vector<2x256xf32>
    %12 = vector.extract_strided_slice %5 {offsets = [0, 256], sizes = [2, 256], strides = [1, 1]} : vector<2x512xf32> to vector<2x256xf32>
    %cst_5 = arith.constant 0.000000e+00 : f32
    %13 = vector.broadcast %cst_5 : f32 to vector<2x256xf32>
    %14 = arith.maximumf %12, %13 : vector<2x256xf32>
    %c0_6 = arith.constant 0 : index
    %c0_7 = arith.constant 0 : index
    %15 = vector.load %arg2[%c0_6, %c0_7] : memref<257x256xf32, #tpu.memory_space<vmem>>, vector<256x256xf32>
    %cst_8 = arith.constant dense<0.000000e+00> : vector<2x256xf32>
    %16 = tpu.matmul %14, %15, %cst_8 {dimension_numbers = #tpu.dot_dimension_numbers<[1], [0], [0], [1], [0, 0, 1, 1], [], []>} : vector<2x256xf32>, vector<256x256xf32>, vector<2x256xf32> -> vector<2x256xf32>
    %c256 = arith.constant 256 : index
    %c0_9 = arith.constant 0 : index
    %17 = vector.load %arg2[%c256, %c0_9] : memref<257x256xf32, #tpu.memory_space<vmem>>, vector<1x256xf32>
    %18 = vector.broadcast %17 : vector<1x256xf32> to vector<2x256xf32>
    %19 = arith.addf %16, %18 : vector<2x256xf32>
    %cst_10 = arith.constant 0.000000e+00 : f32
    %20 = vector.broadcast %cst_10 : f32 to vector<2x256xf32>
    %21 = arith.maximumf %19, %20 : vector<2x256xf32>
    %22 = arith.mulf %21, %11 : vector<2x256xf32>
    %c0_11 = arith.constant 0 : index
    %c0_12 = arith.constant 0 : index
    %23 = vector.load %arg3[%c0_11, %c0_12] : memref<257x36xf32, #tpu.memory_space<vmem>>, vector<256x36xf32>
    %cst_13 = arith.constant dense<0.000000e+00> : vector<2x36xf32>
    %24 = tpu.matmul %22, %23, %cst_13 {dimension_numbers = #tpu.dot_dimension_numbers<[1], [0], [0], [1], [0, 0, 1, 1], [], []>} : vector<2x256xf32>, vector<256x36xf32>, vector<2x36xf32> -> vector<2x36xf32>
    %c256_14 = arith.constant 256 : index
    %c0_15 = arith.constant 0 : index
    %25 = vector.load %arg3[%c256_14, %c0_15] : memref<257x36xf32, #tpu.memory_space<vmem>>, vector<1x36xf32>
    %26 = vector.broadcast %25 : vector<1x36xf32> to vector<2x36xf32>
    %27 = arith.addf %24, %26 : vector<2x36xf32>
    %c0_16 = arith.constant 0 : index
    %c0_17 = arith.constant 0 : index
    %28 = vector.load %arg4[%c0_16, %c0_17] : memref<2x36xf32, #tpu.memory_space<vmem>>, vector<2x36xf32>
    tpu.vector_store %arg4[%c0_16, %c0_17], %27 {strides = array<i32>} : memref<2x36xf32, #tpu.memory_space<vmem>>, vector<2x36xf32>,
    return
  }
}

</mosaic_0001>

<bundles_post_ra>
// kernel: srnn_forward.1
= control target key start
LH: loop header
LB: loop body
LE: loop exit
PB: predicated region body
PF: predicated region fallthrough
CT: control target
= control target key end

     0   :  { %9 = vsyncpa [#allocation3], 0  ;;  %s686_s15 = smov [#allocation2]   ;;  %s885_s0 = inlined_call_operand.vmem [shape: f32[2,32], index: 0, kind: input, shape index: {}]   ;;  %s886_s1 = inlined_call_operand.vmem [shape: f32[33,512], index: 1, kind: input, shape index: {}]   ;;  %s887_s2 = inlined_call_operand.hbm [shape: f32[257,256], index: 2, kind: input, shape index: {}]   ;;  %s888_s3 = inlined_call_operand.vmem [shape: f32[257,36], index: 3, kind: input, shape index: {}]   ;;  %s889_s4 = inlined_call_operand.vmem [shape: f32[2,36], index: 4, kind: output, shape index: {}]  }
   0x1   :  { %s19_s16 = sshll.u32 %s686_s15, 4  ;;  %s662_s19 = scalar_lea.hbm %s887_s2, 8448  ;;  %s20_s16 = int_to_ptr.vmem [resolvable:$true] %s19_s16 }
   0x2   :  { %p663_p0 = scmp.ne.s32.totalorder %s887_s2, %s662_s19  ;;  %p666_p1 = scmp.lt.u32.totalorder %s662_s19, %s887_s2 }
   0x4   :  { %p668_p2 = pnand %p666_p1, %p663_p0 }
   0x6   :  { %671 = shalt.err (!%p668_p2)
}
   0x7   :  { %s672_s24 = scalar_lea.vmem %s20_s16, 8448  ;;  %p677_p4 = scmp.lt.s32.totalorder %s20_s16, %s20_s16 }
   0x8   :  { %p673_p3 = scmp.ne.s32.totalorder %s20_s16, %s672_s24  ;;  %p678_p5 = scmp.lt.s32.totalorder %s672_s24, %s672_s24 }
   0xa   :  { %p679_p6 = por %p678_p5, %p677_p4 }
   0xc   :  { %p680_p7 = pnand %p679_p6, %p673_p3 }
   0xe   :  { %683 = shalt.err (!%p680_p7)
}
   0xf   :  { %s687_s25 = smov 256   ;;  %s688_s26 = smov 16  }
  0x10   :  { %25 = dma.hbm_to_vmem [thread:$0]  %s887_s2, 8448, %s20_s16, [#allocation3], %s687_s25, %s687_s25, %s688_s26  }
  0x11   :  { %684 = dma.done.wait [#allocation3], 8448  }
  0x12   :  { %685 = vsyncadd [#allocation3], 4294958848  ;;  %v689_v0 = vmov 0.0   ;;  %v33_v1 = vld [vmem:[%s886_s1 + $0x8] sm:$0xff]  ;;  %v32_v3 = vld [vmem:[%s886_s1] sm:$0xff]  ;;  %vm71_vm0 = vcmask 261120  }
  0x13   :  { %139 = vmatprep.mubr.f32.mxu1 %v689_v0  ;;  %v37_v2 = vld [vmem:[%s886_s1 + $0x28] sm:$0xff]  ;;  %v36_v5 = vld [vmem:[%s886_s1 + $0x20] sm:$0xff]  ;;  %v35_v12 = vld [vmem:[%s886_s1 + $0x18] sm:$0xff]  ;;  %vm490_vm1 = vcmask 287744  }
  0x14   :  { %v538_v4 = vpack.c.bf16 %v37_v2, %v33_v1  ;;  %v41_v6 = vld [vmem:[%s886_s1 + $0x48] sm:$0xff]  ;;  %v540_v8 = vpack.c.bf16 %v36_v5, %v32_v3  ;;  %v40_v10 = vld [vmem:[%s886_s1 + $0x40] sm:$0xff]  ;;  %v39_v13 = vld [vmem:[%s886_s1 + $0x38] sm:$0xff] }
  0x15   :  { %v45_v7 = vld [vmem:[%s886_s1 + $0x68] sm:$0xff]  ;;  %v44_v11 = vld [vmem:[%s886_s1 + $0x60] sm:$0xff]  ;;  %v34_v15 = vld [vmem:[%s886_s1 + $0x10] sm:$0xff]  ;;  %v546_v17 = vpack.c.bf16 %v39_v13, %v35_v12 }
  0x16   :  { %v542_v9 = vpack.c.bf16 %v45_v7, %v41_v6  ;;  %539 = vmatprep.subr.bf16.mxu1 %v538_v4  ;;  %v544_v14 = vpack.c.bf16 %v44_v11, %v40_v10  ;;  %v38_v16 = vld [vmem:[%s886_s1 + $0x30] sm:$0xff]  ;;  %v43_v18 = vld [vmem:[%s886_s1 + $0x58] sm:$0xff]  ;;  %v232_v20 = vld [vmem:[#allocation2 + $0x8] sm:$0xff] }
  0x17   :  { %541 = vmatpush1.bf16.msra.mxu1 %v540_v8  ;;  %v47_v19 = vld [vmem:[%s886_s1 + $0x78] sm:$0xff]  ;;  %v31_v21 = vld [vmem:[%s885_s0] sm:$0x3]  ;;  %v233_v24 = vld [vmem:[#allocation2 + $0x10] sm:$0xff]  ;;  %v548_v30 = vpack.c.bf16 %v38_v16, %v34_v15 }
  0x18   :  { %543 = vmatprep.subr.bf16.mxu1 %v542_v9  ;;  %v234_v22 = vld [vmem:[#allocation2 + $0x18] sm:$0xff]  ;;  %v231_v23 = vld [vmem:[#allocation2] sm:$0xff]  ;;  %v236_v27 = vld [vmem:[#allocation2 + $0x28] sm:$0xff]  ;;  %v550_v35 = vpack.c.bf16 %v47_v19, %v43_v18 }
  0x19   :  { %v554_v25 = vpack.c.bf16 %v234_v22, %v232_v20  ;;  %v556_v26 = vpack.c.bf16 %v233_v24, %v231_v23  ;;  %v238_v28 = vld [vmem:[#allocation2 + $0x38] sm:$0xff]  ;;  %v235_v29 = vld [vmem:[#allocation2 + $0x20] sm:$0xff]  ;;  %v237_v32 = vld [vmem:[#allocation2 + $0x30] sm:$0xff] }
  0x1a   :  { %v558_v31 = vpack.c.bf16 %v238_v28, %v236_v27  ;;  %v240_v33 = vld [vmem:[#allocation2 + $0x48] sm:$0xff]  ;;  %v242_v34 = vld [vmem:[#allocation2 + $0x58] sm:$0xff]  ;;  %v42_v36 = vld [vmem:[%s886_s1 + $0x50] sm:$0xff]  ;;  %v560_v38 = vpack.c.bf16 %v237_v32, %v235_v29 }
  0x1b   :  { %545 = vmatpush1.bf16.msra.mxu1 %v544_v14  ;;  %v46_v37 = vld [vmem:[%s886_s1 + $0x70] sm:$0xff]  ;;  %555 = vmatprep.subr.bf16.mxu0 %v554_v25  ;;  %v562_v39 = vpack.c.bf16 %v242_v34, %v240_v33  ;;  %v239_v40 = vld [vmem:[#allocation2 + $0x40] sm:$0xff]  ;;  %v244_v43 = vld [vmem:[#allocation2 + $0x68] sm:$0xff] }
  0x1c   :  { %547 = vmatprep.subr.bf16.mxu1 %v546_v17  ;;  %557 = vmatpush1.bf16.msra.mxu0 %v556_v26  ;;  %v241_v41 = vld [vmem:[#allocation2 + $0x50] sm:$0xff]  ;;  %v552_v42 = vpack.c.bf16 %v46_v37, %v42_v36  ;;  %v246_v44 = vld [vmem:[#allocation2 + $0x78] sm:$0xff]  ;;  %v243_v47 = vld [vmem:[#allocation2 + $0x60] sm:$0xff] }
  0x1d   :  { %559 = vmatprep.subr.bf16.mxu0 %v558_v31  ;;  %v564_v45 = vpack.c.bf16 %v241_v41, %v239_v40  ;;  %v566_v46 = vpack.c.bf16 %v246_v44, %v244_v43  ;;  %v245_v48 = vld [vmem:[#allocation2 + $0x70] sm:$0xff]  ;;  %v248_v49 = vld [vmem:[#allocation2 + $0x88] sm:$0xff]  ;;  %v250_v50 = vld [vmem:[#allocation2 + $0x98] sm:$0xff] }
  0x1e   :  { %498 = vmatmul.mubr.msk.f32.vlgmr.msra.gmra.mrb[0].mxu1 %vm71_vm0, %v31_v21  ;;  %v568_v51 = vpack.c.bf16 %v245_v48, %v243_v47  ;;  %v570_v52 = vpack.c.bf16 %v250_v50, %v248_v49  ;;  %v247_v53 = vld [vmem:[#allocation2 + $0x80] sm:$0xff]  ;;  %v249_v54 = vld [vmem:[#allocation2 + $0x90] sm:$0xff]  ;;  %v252_v55 = vld [vmem:[#allocation2 + $0xa8] sm:$0xff] }
  0x1f   :  { %549 = vmatpush1.bf16.msra.mxu1 %v548_v30  ;;  %210 = vmatprep.mubr.f32.mxu1 %v689_v0  ;;  %v254_v56 = vld [vmem:[#allocation2 + $0xb8] sm:$0xff]  ;;  %v572_v57 = vpack.c.bf16 %v249_v54, %v247_v53  ;;  %v251_v59 = vld [vmem:[#allocation2 + $0xa0] sm:$0xff]  ;;  %v253_v60 = vld [vmem:[#allocation2 + $0xb0] sm:$0xff] }
  0x20   :  { %551 = vmatprep.subr.bf16.mxu1 %v550_v35  ;;  %561 = vmatpush1.bf16.msra.mxu0 %v560_v38  ;;  %v574_v58 = vpack.c.bf16 %v254_v56, %v252_v55  ;;  %v256_v61 = vld [vmem:[#allocation2 + $0xc8] sm:$0xff]  ;;  %v258_v62 = vld [vmem:[#allocation2 + $0xd8] sm:$0xff]  ;;  %v576_v63 = vpack.c.bf16 %v253_v60, %v251_v59  ;;  %v255_v1 = vld [vmem:[#allocation2 + $0xc0] sm:$0xff] }
  0x21   :  { %563 = vmatprep.subr.bf16.mxu0 %v562_v39  ;;  %v578_v0 = vpack.c.bf16 %v258_v62, %v256_v61  ;;  %v257_v2 = vld [vmem:[#allocation2 + $0xd0] sm:$0xff]  ;;  %v260_v3 = vld [vmem:[#allocation2 + $0xe8] sm:$0xff]  ;;  %v262_v4 = vld [vmem:[#allocation2 + $0xf8] sm:$0xff] }
  0x22   :  { %v580_v5 = vpack.c.bf16 %v257_v2, %v255_v1  ;;  %v582_v6 = vpack.c.bf16 %v262_v4, %v260_v3  ;;  %v259_v7 = vld [vmem:[#allocation2 + $0xe0] sm:$0xff]  ;;  %v261_v8 = vld [vmem:[#allocation2 + $0xf0] sm:$0xff]  ;;  %v264_v9 = vld [vmem:[#allocation2 + $0x108] sm:$0xff] }
  0x23   :  { %553 = vmatpush1.bf16.msra.mxu1 %v552_v42  ;;  %v266_v10 = vld [vmem:[#allocation2 + $0x118] sm:$0xff]  ;;  %v584_v11 = vpack.c.bf16 %v261_v8, %v259_v7  ;;  %v263_v13 = vld [vmem:[#allocation2 + $0x100] sm:$0xff]  ;;  %v265_v14 = vld [vmem:[#allocation2 + $0x110] sm:$0xff] }
  0x24   :  { %565 = vmatpush1.bf16.msra.mxu0 %v564_v45  ;;  %v586_v12 = vpack.c.bf16 %v266_v10, %v264_v9  ;;  %v268_v15 = vld [vmem:[#allocation2 + $0x128] sm:$0xff]  ;;  %v270_v16 = vld [vmem:[#allocation2 + $0x138] sm:$0xff]  ;;  %v588_v17 = vpack.c.bf16 %v265_v14, %v263_v13  ;;  %v267_v19 = vld [vmem:[#allocation2 + $0x120] sm:$0xff] }
  0x25   :  { %567 = vmatprep.subr.bf16.mxu0 %v566_v46  ;;  %v590_v18 = vpack.c.bf16 %v270_v16, %v268_v15  ;;  %v269_v20 = vld [vmem:[#allocation2 + $0x130] sm:$0xff]  ;;  %v274_v22 = vld [vmem:[#allocation2 + $0x158] sm:$0xff]  ;;  %v271_v25 = vld [vmem:[#allocation2 + $0x140] sm:$0xff] }
  0x26   :  { %499 = vmatmul.mubr.msk.f32.vlgmr.msra.gmra.mrb[2].mxu1 %vm71_vm0, %v31_v21  ;;  %v272_v21 = vld [vmem:[#allocation2 + $0x148] sm:$0xff]  ;;  %v592_v23 = vpack.c.bf16 %v269_v20, %v267_v19  ;;  %v273_v26 = vld [vmem:[#allocation2 + $0x150] sm:$0xff]  ;;  %v278_v28 = vld [vmem:[#allocation2 + $0x178] sm:$0xff] }
  0x27   :  { %v594_v24 = vpack.c.bf16 %v274_v22, %v272_v21  ;;  %v276_v27 = vld [vmem:[#allocation2 + $0x168] sm:$0xff]  ;;  %v596_v29 = vpack.c.bf16 %v273_v26, %v271_v25  ;;  %v275_v31 = vld [vmem:[#allocation2 + $0x160] sm:$0xff]  ;;  %v277_v32 = vld [vmem:[#allocation2 + $0x170] sm:$0xff] }
  0x28   :  { %569 = vmatpush1.bf16.msra.mxu0 %v568_v51  ;;  %v598_v30 = vpack.c.bf16 %v278_v28, %v276_v27  ;;  %v280_v33 = vld [vmem:[#allocation2 + $0x188] sm:$0xff]  ;;  %v282_v34 = vld [vmem:[#allocation2 + $0x198] sm:$0xff]  ;;  %v600_v35 = vpack.c.bf16 %v277_v32, %v275_v31  ;;  %v279_v37 = vld [vmem:[#allocation2 + $0x180] sm:$0xff] }
  0x29   :  { %571 = vmatprep.subr.bf16.mxu0 %v570_v52  ;;  %v602_v36 = vpack.c.bf16 %v282_v34, %v280_v33  ;;  %v281_v38 = vld [vmem:[#allocation2 + $0x190] sm:$0xff]  ;;  %v284_v40 = vld [vmem:[#allocation2 + $0x1a8] sm:$0xff]  ;;  %v286_v41 = vld [vmem:[#allocation2 + $0x1b8] sm:$0xff] }
  0x2a   :  { %v604_v39 = vpack.c.bf16 %v281_v38, %v279_v37  ;;  %v606_v42 = vpack.c.bf16 %v286_v41, %v284_v40  ;;  %v283_v43 = vld [vmem:[#allocation2 + $0x1a0] sm:$0xff]  ;;  %v285_v44 = vld [vmem:[#allocation2 + $0x1b0] sm:$0xff]  ;;  %v288_v46 = vld [vmem:[#allocation2 + $0x1c8] sm:$0xff] }
  0x2b   :  { %v608_v45 = vpack.c.bf16 %v285_v44, %v283_v43  ;;  %v290_v47 = vld [vmem:[#allocation2 + $0x1d8] sm:$0xff]  ;;  %v287_v49 = vld [vmem:[#allocation2 + $0x1c0] sm:$0xff]  ;;  %v289_v50 = vld [vmem:[#allocation2 + $0x1d0] sm:$0xff] }
  0x2c   :  { %573 = vmatpush1.bf16.msra.mxu0 %v572_v57  ;;  %v610_v48 = vpack.c.bf16 %v290_v47, %v288_v46  ;;  %v612_v51 = vpack.c.bf16 %v289_v50, %v287_v49  ;;  %v292_v52 = vld [vmem:[#allocation2 + $0x1e8] sm:$0xff]  ;;  %v294_v53 = vld [vmem:[#allocation2 + $0x1f8] sm:$0xff]  ;;  %v291_v55 = vld [vmem:[#allocation2 + $0x1e0] sm:$0xff] }
  0x2d   :  { %575 = vmatprep.subr.bf16.mxu0 %v574_v58  ;;  %v614_v54 = vpack.c.bf16 %v294_v53, %v292_v52  ;;  %v293_v56 = vld [vmem:[#allocation2 + $0x1f0] sm:$0xff]  ;;  %v399_v58 = vld [vmem:[%s888_s3 + $0x80] sm:$0xff]  ;;  %v400_v59 = vld [vmem:[%s888_s3 + $0x88] sm:$0xff] }
  0x2e   :  { %v616_v57 = vpack.c.bf16 %v293_v56, %v291_v55  ;;  %v383_v60 = vld [vmem:[%s888_s3] sm:$0xff]  ;;  %v618_v61 = vpack.c.bf16 %v400_v59, %v399_v58  ;;  %v384_v62 = vld [vmem:[%s888_s3 + $0x8] sm:$0xff]  ;;  %v385_v3 = vld [vmem:[%s888_s3 + $0x10] sm:$0xff] }
  0x2f   :  { %v620_v1 = vpack.c.bf16 %v384_v62, %v383_v60  ;;  %v386_v4 = vld [vmem:[%s888_s3 + $0x18] sm:$0xff]  ;;  %v387_v9 = vld [vmem:[%s888_s3 + $0x20] sm:$0xff]  ;;  %v388_v10 = vld [vmem:[%s888_s3 + $0x28] sm:$0xff] }
  0x30   :  { %577 = vmatpush1.bf16.msra.mxu0 %v576_v63  ;;  %v401_v63 = vld [vmem:[%s888_s3 + $0x90] sm:$0xff]  ;;  %619 = vmatprep.subr.bf16.mxu1 %v618_v61  ;;  %v624_v7 = vpack.c.bf16 %v386_v4, %v385_v3  ;;  %v628_v13 = vpack.c.bf16 %v388_v10, %v387_v9  ;;  %v390_v16 = vld [vmem:[%s888_s3 + $0x38] sm:$0xff]  ;;  %v391_v21 = vld [vmem:[%s888_s3 + $0x40] sm:$0xff] }
  0x31   :  { %579 = vmatprep.subr.bf16.mxu0 %v578_v0  ;;  %v402_v0 = vld [vmem:[%s888_s3 + $0x98] sm:$0xff]  ;;  %621 = vmatpush3.bf16.msra.mxu1 %v620_v1  ;;  %v389_v15 = vld [vmem:[%s888_s3 + $0x30] sm:$0xff]  ;;  %v392_v22 = vld [vmem:[%s888_s3 + $0x48] sm:$0xff] }
  0x32   :  { %v622_v2 = vpack.c.bf16 %v402_v0, %v401_v63  ;;  %v632_v19 = vpack.c.bf16 %v390_v16, %v389_v15  ;;  %v636_v25 = vpack.c.bf16 %v392_v22, %v391_v21  ;;  %v393_v27 = vld [vmem:[%s888_s3 + $0x50] sm:$0xff]  ;;  %v394_v28 = vld [vmem:[%s888_s3 + $0x58] sm:$0xff]  ;;  %v412_v46 = vld [vmem:[%s888_s3 + $0xe8] sm:$0xff] }
  0x33   :  { %v396_v49 = vld [vmem:[%s888_s3 + $0x68] sm:$0xff]  ;;  %v414_v52 = vld [vmem:[%s888_s3 + $0xf8] sm:$0xff] }
  0x34   :  { %581 = vmatpush1.bf16.msra.mxu0 %v580_v5  ;;  %v403_v5 = vld [vmem:[%s888_s3 + $0xa0] sm:$0xff]  ;;  %623 = vmatprep.subr.bf16.mxu1 %v622_v2  ;;  %v398_v55 = vld [vmem:[%s888_s3 + $0x78] sm:$0xff] }
  0x35   :  { %583 = vmatprep.subr.bf16.mxu0 %v582_v6  ;;  %v404_v6 = vld [vmem:[%s888_s3 + $0xa8] sm:$0xff]  ;;  %625 = vmatpush3.bf16.msra.mxu1 %v624_v7 }
  0x36   :  { %v626_v8 = vpack.c.bf16 %v404_v6, %v403_v5  ;;  %v296_v5 = vld [vmem:[#allocation2 + $0x200] ss:$8 sm:$0x3] }
  0x38   :  { %585 = vmatpush1.bf16.msra.mxu0 %v584_v11  ;;  %v405_v11 = vld [vmem:[%s888_s3 + $0xb0] sm:$0xff]  ;;  %627 = vmatprep.subr.bf16.mxu1 %v626_v8 }
  0x39   :  { %587 = vmatprep.subr.bf16.mxu0 %v586_v12  ;;  %v406_v12 = vld [vmem:[%s888_s3 + $0xb8] sm:$0xff]  ;;  %629 = vmatpush3.bf16.msra.mxu1 %v628_v13 }
  0x3a   :  { %v630_v14 = vpack.c.bf16 %v406_v12, %v405_v11 }
  0x3c   :  { %589 = vmatpush1.bf16.msra.mxu0 %v588_v17  ;;  %v407_v17 = vld [vmem:[%s888_s3 + $0xc0] sm:$0xff]  ;;  %631 = vmatprep.subr.bf16.mxu1 %v630_v14 }
  0x3d   :  { %591 = vmatprep.subr.bf16.mxu0 %v590_v18  ;;  %v408_v18 = vld [vmem:[%s888_s3 + $0xc8] sm:$0xff]  ;;  %633 = vmatpush3.bf16.msra.mxu1 %v632_v19  ;;  %v502_v19 = vld [vmem:[%s888_s3 + $0x100] ss:$0 sm:$0xff] }
  0x3e   :  { %v634_v20 = vpack.c.bf16 %v408_v18, %v407_v17 }
  0x40   :  { %593 = vmatpush1.bf16.msra.mxu0 %v592_v23  ;;  %v409_v23 = vld [vmem:[%s888_s3 + $0xd0] sm:$0xff]  ;;  %635 = vmatprep.subr.bf16.mxu1 %v634_v20 }
  0x41   :  { %595 = vmatprep.subr.bf16.mxu0 %v594_v24  ;;  %v410_v24 = vld [vmem:[%s888_s3 + $0xd8] sm:$0xff]  ;;  %637 = vmatpush3.bf16.msra.mxu1 %v636_v25 }
  0x42   :  { %v638_v26 = vpack.c.bf16 %v410_v24, %v409_v23 }
  0x44   :  { %597 = vmatpush1.bf16.msra.mxu0 %v596_v29  ;;  %v640_v29 = vpack.c.bf16 %v394_v28, %v393_v27  ;;  %639 = vmatprep.subr.bf16.mxu1 %v638_v26 }
  0x45   :  { %599 = vmatprep.subr.bf16.mxu0 %v598_v30  ;;  %v51_v30 = vlaneseq }
  0x46   :  { %641 = vmatpush3.bf16.msra.mxu1 %v640_v29 }
  0x47   :  { %v52_v31 = vshrl.u32 %v51_v30, 7 }
  0x48   :  { %601 = vmatpush1.bf16.msra.mxu0 %v600_v35 }
  0x49   :  { %603 = vmatprep.subr.bf16.mxu0 %v602_v36  ;;  %v61_v34 = vsub.s32 2, %v52_v31  ;;  %v65_v35 = vsub.s32 3, %v52_v31  ;;  %v497_v36 = vld [vmem:[%s886_s1 + $0x80] ss:$8 sm:$0xf]  ;;  %v57_v58 = vsub.s32 1, %v52_v31 }
  0x4b   :  { %v62_v37 = vrot.slane %v497_v36, %v61_v34  ;;  %v66_v38 = vrot.slane %v497_v36, %v65_v35  ;;  %v58_v60 = vrot.slane %v497_v36, %v57_v58  ;;  %v305_v7 = vrot.slane %v296_v5, %v57_v58 }
  0x4c   :  { %605 = vmatpush1.bf16.msra.mxu0 %v604_v39 }
  0x4d   :  { %607 = vmatprep.subr.bf16.mxu0 %v606_v42 }
  0x50   :  { %609 = vmatpush1.bf16.msra.mxu0 %v608_v45  ;;  %v411_v45 = vld [vmem:[%s888_s3 + $0xe0] sm:$0xff] }
  0x51   :  { %611 = vmatprep.subr.bf16.mxu0 %v610_v48  ;;  %v642_v47 = vpack.c.bf16 %v412_v46, %v411_v45  ;;  %v395_v48 = vld [vmem:[%s888_s3 + $0x60] sm:$0xff] }
  0x52   :  { %v644_v50 = vpack.c.bf16 %v396_v49, %v395_v48 }
  0x53   :  { %643 = vmatprep.subr.bf16.mxu1 %v642_v47 }
  0x54   :  { %613 = vmatpush1.bf16.msra.mxu0 %v612_v51  ;;  %645 = vmatpush3.bf16.msra.mxu1 %v644_v50  ;;  %v413_v51 = vld [vmem:[%s888_s3 + $0xf0] sm:$0xff] }
  0x55   :  { %615 = vmatprep.subr.bf16.mxu0 %v614_v54  ;;  %v646_v53 = vpack.c.bf16 %v414_v52, %v413_v51  ;;  %v397_v54 = vld [vmem:[%s888_s3 + $0x70] sm:$0xff] }
  0x56   :  { %v648_v56 = vpack.c.bf16 %v398_v55, %v397_v54 }
  0x57   :  { %647 = vmatprep.subr.bf16.mxu1 %v646_v53 }
  0x58   :  { %617 = vmatpush1.bf16.msra.mxu0 %v616_v57  ;;  %649 = vmatpush3.bf16.msra.mxu1 %v648_v56  ;;  %v53_v57 = vsub.s32 0, %v52_v31 }
  0x5a   :  { %v54_v59 = vrot.slane %v497_v36, %v53_v57  ;;  %v301_v6 = vrot.slane %v296_v5, %v53_v57 }
  0xf1   :  { %v141_v32 = vpop.f32.mrb[0].mxu1 }
  0xf2   :  { %v143_v33 = vpop.f32.mrb[1].mxu1  ;;  %v142_v61 = vadd.f32 %v141_v32, %v54_v59 }
  0xf3   :  { %v144_v62 = vadd.f32 %v143_v33, %v58_v60 }
  0xf4   :  { %v500_v63 = vmul.f32 -1.442695, %v142_v61 }
  0xf5   :  { %v501_v0 = vmul.f32 -1.442695, %v144_v62 }
  0xf6   :  { %654 = vpow2.f32 %v500_v63 }
  0xf7   :  { %656 = vpow2.f32 %v501_v0 }
  0xf9   :  { %v212_v39 = vpop.f32.mrb[2].mxu1 }
  0xfa   :  { %v213_v40 = vadd.f32 %v212_v39, %v62_v37  ;;  %v214_v41 = vpop.f32.mrb[3].mxu1 }
  0xfb   :  { %v215_v42 = vadd.f32 %v214_v41, %v66_v38 }
  0xfc   :  { %v229_v44 = vmax.f32 %v213_v40, 0.0 }
  0xfd   :  { %v230_v43 = vmax.f32 %v215_v42, 0.0 }
  0xff   :  { %372 = vmatprep.mubr.f32.mxu0 %v230_v43 }
 0x100   :  { %373 = vmatmul.mubr.f32.vlgmr.msra.gmra.mrb[0].mxu0 %v229_v44  ;;  %v655_v1 = vpop.eup %654 }
 0x101   :  { %v657_v2 = vpop.eup %656  ;;  %v223_v3 = vadd.f32 1.0, %v655_v1 }
 0x102   :  { %v224_v4 = vadd.f32 1.0, %v657_v2 }
 0x103   :  { %658 = vrcp.f32 %v223_v3 }
 0x104   :  { %660 = vrcp.f32 %v224_v4 }
 0x10d   :  { %v659_v13 = vpop.eup %658 }
 0x10e   :  { %v661_v15 = vpop.eup %660 }
 0x1d3   :  { %v374_v8 = vpop.f32.mrb[0].mxu0 }
 0x1d4   :  { %v375_v9 = vadd.f32 %v374_v8, %v301_v6  ;;  %v376_v10 = vpop.f32.mrb[1].mxu0 }
 0x1d5   :  { %v377_v11 = vadd.f32 %v376_v10, %v305_v7 }
 0x1d6   :  { %v379_v12 = vmax.f32 %v375_v9, 0.0 }
 0x1d7   :  { %v380_v14 = vmax.f32 %v377_v11, 0.0 }
 0x1d8   :  { %v381_v16 = vmul.f32 %v659_v13, %v379_v12 }
 0x1d9   :  { %v382_v17 = vmul.f32 %v661_v15, %v380_v14 }
 0x1db   :  { %484 = vmatprep.mubr.f32.mxu1 %v382_v17 }
 0x1dc   :  { %485 = vmatmul.mubr.f32.vlgmr.msra.gmra.mrb[4].mxu1 %v381_v16 }
 0x2af   :  { %v535_v18 = vpop.f32.mrb[4].mxu1 }
 0x2b0   :  { %v536_v20 = vpop.f32.mrb[5].mxu1 }
 0x2b1   :  { %v537_v21 = vadd.f32 %v536_v20, %v535_v18 }
 0x2b3   :  { %v487_v22 = vadd.f32 %v537_v21, %v502_v19 }
 0x2b5   :  { %491 = vst.msk [vmem:[%s889_s4] sm:$0x3] %vm490_vm1, %v487_v22 }
 0x2b6   :  { %496 = vsyncpa [#allocation3], 1 }

</bundles_post_ra>
